<compile_context>
chip_gen: v6e
topology: v6e:2x2x1
jax: 0.10.0
libtpu: 0.0.40
codegen_flags: <defaults>
</compile_context>

<pallas_src>
import numpy as np
import jax
import jax.numpy as jnp
from jax.experimental import pallas as pl
from jax.experimental.pallas import tpu as pltpu


def _round_up(a, b):
    return -(-a // b) * b


def _edge_weight_vec():
    # Flattened 4x4 mask: interior positions {5, 6, 9, 10} are zero.
    w = np.full((16,), 1.0 / 12.0, dtype=np.float32)
    w[[5, 6, 9, 10]] = 0.0
    return w


def _edge_weight_matrix():
    # (128, 8) block-diagonal: column g carries the 16-tap edge weights for the
    # g-th item packed into lanes [16g, 16g+15] of a 128-lane row.
    wv = _edge_weight_vec()
    m = np.zeros((128, 8), dtype=np.float32)
    for g in range(8):
        m[g * 16:(g + 1) * 16, g] = wv
    return jnp.asarray(m)


def _edge_pool_einsum(x):
    ew = jnp.asarray(_edge_weight_vec().reshape(4, 4))
    ep = jnp.einsum('nchw,hw->nc', x.astype(jnp.float32), ew)
    return ep[:, :, None, None]


def _edge_pool_kernel(x_ref, w_ref, o_ref):
    # x_ref: (TILE_R, 128) -- 8 (n,c) items x 16 spatial values per row.
    # w_ref: (128, 8) block-diagonal edge weights (resident across grid steps).
    # o_ref: (TILE_R, 8) f32 pooled outputs.
    x = x_ref[...].astype(jnp.float32)
    o_ref[...] = jnp.dot(
        x, w_ref[...],
        precision=jax.lax.Precision.HIGHEST,
        preferred_element_type=jnp.float32)


def edge_pool2d(x, *, tile_rows=4096, min_bytes_for_pallas=256 * 1024):
    """x: (N, C, 4, 4) float32/bfloat16. Returns (N, C, 1, 1) float32."""
    n, c, h, w = x.shape
    assert (h, w) == (4, 4), "EdgePool2d edge_weights are fixed at 4x4"
    nc = n * c
    hw = h * w

    # Small-input fast path: launch overhead dwarfs reading a few KiB.
    if nc * hw * x.dtype.itemsize < min_bytes_for_pallas:
        return _edge_pool_einsum(x)

    # Natural contiguous layout: 8 items (16 values each) per 128-lane row.
    xf = x.reshape(nc * hw)
    nc_pad = max(64, _round_up(nc, 8))   # need whole 128-lane rows, >=8 rows
    if nc_pad != nc:
        # Only triggers for ragged N*C (uncommon); one small copy.
        xf = jnp.pad(xf, (0, (nc_pad - nc) * hw))
    rows = nc_pad // 8
    x2d = xf.reshape(rows, 128)          # free reshape of contiguous memory

    # Tile: ~2 MiB f32 per block, multiple of 8 rows, and capped so the grid
    # has >=2 parallel steps whenever there is enough work (v7x megacore).
    tile_r = min(tile_rows, max(8, _round_up(-(-rows // 2), 8)))
    grid = (pl.cdiv(rows, tile_r),)      # last block may overhang (clipped)

    w_mat = _edge_weight_matrix()

    out = pl.pallas_call(
        _edge_pool_kernel,
        out_shape=jax.ShapeDtypeStruct((rows, 8), jnp.float32),
        grid=grid,
        in_specs=[
            pl.BlockSpec((tile_r, 128), lambda i: (i, 0)),
            pl.BlockSpec((128, 8), lambda i: (0, 0)),   # fetched once, resident
        ],
        out_specs=pl.BlockSpec((tile_r, 8), lambda i: (i, 0)),
        compiler_params=pltpu.CompilerParams(
            dimension_semantics=("parallel",)),
        cost_estimate=pl.CostEstimate(
            flops=2 * rows * 128 * 8,
            transcendentals=0,
            bytes_accessed=rows * 128 * x.dtype.itemsize
            + 128 * 8 * 4 + rows * 8 * 4),
    )(x2d, w_mat)

    return out.reshape(rows * 8)[:nc].reshape(n, c, 1, 1)


def edge_pool2d_ref(x):
    edge_weights = jnp.array(
        [[1, 1, 1, 1],
         [1, 0, 0, 1],
         [1, 0, 0, 1],
         [1, 1, 1, 1]], dtype=jnp.float32) * (1.0 / 12.0)
    ep = jnp.einsum('nchw,hw->nc', x.astype(jnp.float32), edge_weights)
    return ep[:, :, None, None]


if __name__ == "__main__":
    key = jax.random.PRNGKey(0)
    k1, k2, k3 = jax.random.split(key, 3)

    # Small shape consistent with the module (spatial fixed at 4x4); force the
    # kernel path (single grid step, padded up to one full 128-lane tile).
    x_small = jax.random.normal(k1, (2, 4, 4, 4), dtype=jnp.float32)
    out_small = jax.block_until_ready(edge_pool2d(x_small, min_bytes_for_pallas=0))
    ref_small = edge_pool2d_ref(x_small)
    assert out_small.shape == (2, 4, 1, 1)
    assert jnp.allclose(out_small, ref_small, atol=1e-4, rtol=1e-4)

    # N*C = 600: multi-step grid with an overhanging (clipped) last block.
    x_mid = jax.random.normal(k2, (5, 120, 4, 4), dtype=jnp.float32)
    out_mid = jax.block_until_ready(edge_pool2d(x_mid, min_bytes_for_pallas=0))
    assert out_mid.shape == (5, 120, 1, 1)
    assert jnp.allclose(out_mid, edge_pool2d_ref(x_mid), atol=1e-4, rtol=1e-4)

    # N*C = 201 (not a multiple of 8): exercises the ragged-tail pad path.
    x_rag = jax.random.normal(k3, (3, 67, 4, 4), dtype=jnp.float32)
    out_rag = jax.block_until_ready(edge_pool2d(x_rag, min_bytes_for_pallas=0))
    assert out_rag.shape == (3, 67, 1, 1)
    assert jnp.allclose(out_rag, edge_pool2d_ref(x_rag), atol=1e-4, rtol=1e-4)

    # Default small-input einsum fast path.
    out_fast = jax.block_until_ready(edge_pool2d(x_small))
    assert jnp.allclose(out_fast, ref_small, atol=1e-5, rtol=1e-5)

    print("KERNEL_OK")
</pallas_src>

<mosaic_0001>
module attributes {stable_mosaic.version = 11 : i64} {
  func.func @_edge_pool_kernel(%arg0: i32, %arg1: memref<8x128xf32, #tpu.memory_space<vmem>>, %arg2: memref<128x8xf32, #tpu.memory_space<vmem>>, %arg3: memref<8x8xf32, #tpu.memory_space<vmem>>) attributes {dimension_semantics = [#tpu.dimension_semantics<parallel>], iteration_bounds = array<i64: 1>, scalar_prefetch = 0 : i64, scratch_operands = 0 : i64, tpu.core_type = #tpu.core_type<tc>, window_params = [{transform_indices = @transform_0, window_bounds = array<i64: 8, 128>}, {pipeline_mode = #tpu.pipeline_mode<synchronous>, transform_indices = @transform_1, window_bounds = array<i64: 128, 8>}, {transform_indices = @transform_2, window_bounds = array<i64: 8, 8>}]} {
    %c0 = arith.constant 0 : index
    %c0_0 = arith.constant 0 : index
    %0 = vector.load %arg1[%c0, %c0_0] : memref<8x128xf32, #tpu.memory_space<vmem>>, vector<8x128xf32>
    %c0_1 = arith.constant 0 : index
    %c0_2 = arith.constant 0 : index
    %1 = vector.load %arg2[%c0_1, %c0_2] : memref<128x8xf32, #tpu.memory_space<vmem>>, vector<128x8xf32>
    %cst = arith.constant dense<0.000000e+00> : vector<8x8xf32>
    %2 = tpu.matmul %0, %1, %cst {dimension_numbers = #tpu.dot_dimension_numbers<[1], [0], [0], [1], [0, 0, 1, 1], [], []>, precision = #tpu.contract_precision<fp32>} : vector<8x128xf32>, vector<128x8xf32>, vector<8x8xf32> -> vector<8x8xf32>
    %c0_3 = arith.constant 0 : index
    %c0_4 = arith.constant 0 : index
    %3 = vector.load %arg3[%c0_3, %c0_4] : memref<8x8xf32, #tpu.memory_space<vmem>>, vector<8x8xf32>
    tpu.vector_store %arg3[%c0_3, %c0_4], %2 {strides = array<i32>} : memref<8x8xf32, #tpu.memory_space<vmem>>, vector<8x8xf32>,
    return
  }
  func.func @transform_0(%arg0: i32) -> (i32, i32) {
    %c0_i32 = arith.constant 0 : i32
    %c0_i32_0 = arith.constant 0 : i32
    return %arg0, %c0_i32 : i32, i32
  }
  func.func @transform_1(%arg0: i32) -> (i32, i32) {
    %c0_i32 = arith.constant 0 : i32
    %c0_i32_0 = arith.constant 0 : i32
    %c0_i32_1 = arith.constant 0 : i32
    return %c0_i32, %c0_i32_0 : i32, i32
  }
  func.func @transform_2(%arg0: i32) -> (i32, i32) {
    %c0_i32 = arith.constant 0 : i32
    %c0_i32_0 = arith.constant 0 : i32
    return %arg0, %c0_i32 : i32, i32
  }
}

</mosaic_0001>

<bundles_post_ra>
// kernel: tpu_custom_call.1
= control target key start
LH: loop header
LB: loop body
LE: loop exit
PB: predicated region body
PF: predicated region fallthrough
CT: control target
= control target key end

     0   :  { %v1023_v3 = vmov 0.0   ;;  %vm1024_vm0 = vmmov 0   ;;  %s1458_s0 = inlined_call_operand.vmem [shape: f32[8,128], index: 0, kind: input, shape index: {}]   ;;  %s1459_s1 = inlined_call_operand.vmem [shape: f32[128,8], index: 1, kind: input, shape index: {}]   ;;  %s1460_s2 = inlined_call_operand.hbm [shape: f32[8,8], index: 2, kind: output, shape index: {}]  }
   0x1   :  { %v28_v0 = vld [vmem:[%s1459_s1 + $0x78] sm:$0xff]  ;;  %v27_v1 = vld [vmem:[%s1459_s1 + $0x70] sm:$0xff]  ;;  %v26_v2 = vld [vmem:[%s1459_s1 + $0x68] sm:$0xff]  ;;  %788 = vmatprep.subr.mxu0 %v1023_v3  ;;  %823 = vmatprep.subr.mxu1 %v1023_v3 }
   0x2   :  { %v1051_v4 = vand.u32 4294901760, %v28_v0  ;;  %v1053_v5 = vand.u32 4294901760, %v27_v1  ;;  %v1055_v6 = vand.u32 4294901760, %v26_v2  ;;  %v25_v7 = vld [vmem:[%s1459_s1 + $0x60] sm:$0xff]  ;;  %v24_v8 = vld [vmem:[%s1459_s1 + $0x58] sm:$0xff]  ;;  %v23_v9 = vld [vmem:[%s1459_s1 + $0x50] sm:$0xff]  ;;  %820 = vmatprep.mubr.msk.f32.mxu0 %vm1024_vm0, %v1023_v3  ;;  %855 = vmatprep.mubr.msk.f32.mxu1 %vm1024_vm0, %v1023_v3 }
   0x3   :  { %v1067_v10 = vand.u32 4294901760, %v25_v7  ;;  %v1069_v11 = vand.u32 4294901760, %v24_v8  ;;  %v1071_v12 = vand.u32 4294901760, %v23_v9  ;;  %v22_v13 = vld [vmem:[%s1459_s1 + $0x48] sm:$0xff]  ;;  %v21_v14 = vld [vmem:[%s1459_s1 + $0x40] sm:$0xff]  ;;  %v20_v19 = vld [vmem:[%s1459_s1 + $0x38] sm:$0xff] }
   0x4   :  { %789 = vmatpush3.msra.mxu0 %v1051_v4  ;;  %v1085_v15 = vsub.f32 %v28_v0, %v1051_v4  ;;  %v1088_v16 = vsub.f32 %v27_v1, %v1053_v5  ;;  %v1090_v17 = vand.u32 4294901760, %v22_v13  ;;  %v1093_v18 = vsub.f32 %v26_v2, %v1055_v6  ;;  %v19_v26 = vld [vmem:[%s1459_s1 + $0x30] sm:$0xff] }
   0x5   :  { %790 = vmatprep.subr.mxu0 %v1023_v3  ;;  %v1100_v20 = vsub.f32 %v25_v7, %v1067_v10  ;;  %v1103_v21 = vsub.f32 %v24_v8, %v1069_v11  ;;  %v1109_v25 = vand.u32 4294901760, %v21_v14  ;;  %v1116_v28 = vand.u32 4294901760, %v20_v19 }
   0x6   :  { %791 = vmatpush3.msra.mxu0 %v1053_v5  ;;  %v123_v22 = vand.u32 4294901760, %v1085_v15  ;;  %v130_v23 = vand.u32 4294901760, %v1088_v16  ;;  %v137_v24 = vand.u32 4294901760, %v1093_v18  ;;  %v1120_v30 = vsub.f32 %v23_v9, %v1071_v12 }
   0x7   :  { %792 = vmatprep.subr.mxu0 %v1023_v3  ;;  %v144_v27 = vand.u32 4294901760, %v1100_v20  ;;  %v151_v29 = vand.u32 4294901760, %v1103_v21 }
   0x8   :  { %7 = vsyncpa [#allocation3], 0  ;;  %793 = vmatpush3.msra.mxu0 %v1055_v6  ;;  %v124_v31 = vsub.f32 %v1085_v15, %v123_v22  ;;  %v131_v32 = vsub.f32 %v1088_v16, %v130_v23  ;;  %v138_v33 = vsub.f32 %v1093_v18, %v137_v24  ;;  %v1133_v34 = vsub.f32 %v22_v13, %v1090_v17  ;;  %v18_v36 = vld [vmem:[%s1459_s1 + $0x28] sm:$0xff]  ;;  %v17_v41 = vld [vmem:[%s1459_s1 + $0x20] sm:$0xff] }
   0x9   :  { %794 = vmatprep.subr.mxu0 %v1023_v3  ;;  %v1136_v35 = vand.u32 4294901760, %v19_v26  ;;  %v145_v39 = vsub.f32 %v1100_v20, %v144_v27  ;;  %v158_v40 = vand.u32 4294901760, %v1120_v30  ;;  %v152_v42 = vsub.f32 %v1103_v21, %v151_v29  ;;  %v16_v49 = vld [vmem:[%s1459_s1 + $0x18] sm:$0xff]  ;;  %v12_v50 = vld [vmem:[%s1458_s0] sm:$0xff]  ;;  %v15_v54 = vld [vmem:[%s1459_s1 + $0x10] sm:$0xff] }
   0xa   :  { %795 = vmatpush3.msra.mxu0 %v1067_v10  ;;  %v125_v37 = vand.u32 4294901760, %v124_v31  ;;  %v132_v38 = vand.u32 4294901760, %v131_v32  ;;  %v1154_v43 = vsub.f32 %v21_v14, %v1109_v25  ;;  %v139_v44 = vand.u32 4294901760, %v138_v33  ;;  %v14_v60 = vld [vmem:[%s1459_s1 + $0x8] sm:$0xff]  ;;  %v13_v7 = vld [vmem:[%s1459_s1] sm:$0xff]  ;;  %s1025_s1 = smov [#allocation2]  }
   0xb   :  { %796 = vmatprep.subr.mxu0 %v1023_v3  ;;  %v1157_v45 = vand.u32 4294901760, %v18_v36  ;;  %v165_v46 = vand.u32 4294901760, %v1133_v34  ;;  %v1161_v47 = vsub.f32 %v20_v19, %v1116_v28  ;;  %v1165_v48 = vand.u32 4294901760, %v17_v41  ;;  %s678_s14 = sshll.u32 %s1025_s1, 4  ;;  %s679_s14 = int_to_ptr.vmem [resolvable:$true] %s678_s14 }
   0xc   :  { %797 = vmatpush3.msra.mxu0 %v1069_v11  ;;  %824 = vmatpush3.msra.mxu1 %v125_v37  ;;  %v146_v51 = vand.u32 4294901760, %v145_v39  ;;  %v159_v52 = vsub.f32 %v1120_v30, %v158_v40  ;;  %v172_v53 = vand.u32 4294901760, %v1154_v43  ;;  %v1182_v55 = vsub.f32 %v19_v26, %v1136_v35  ;;  %s1001_s15 = scalar_lea.vmem %s679_s14, 128  ;;  %p1006_p1 = scmp.lt.s32.totalorder %s679_s14, %s679_s14 }
   0xd   :  { %798 = vmatprep.subr.mxu0 %v1023_v3  ;;  %825 = vmatprep.subr.mxu1 %v1023_v3  ;;  %v153_v56 = vand.u32 4294901760, %v152_v42  ;;  %v179_v57 = vand.u32 4294901760, %v1161_v47  ;;  %v166_v58 = vsub.f32 %v1133_v34, %v165_v46  ;;  %v1191_v59 = vand.u32 4294901760, %v16_v49  ;;  %p1002_p0 = scmp.ne.s32.totalorder %s679_s14, %s1001_s15  ;;  %p1007_p2 = scmp.lt.s32.totalorder %s1001_s15, %s1001_s15 }
   0xe   :  { %799 = vmatpush3.msra.mxu0 %v1071_v12  ;;  %826 = vmatpush3.msra.mxu1 %v132_v38  ;;  %v1197_v61 = vsub.f32 %v18_v36, %v1157_v45  ;;  %v1199_v62 = vand.u32 4294901760, %v12_v50  ;;  %v1203_v63 = vand.u32 4294901760, %v15_v54  ;;  %v160_v0 = vand.u32 4294901760, %v159_v52 }
   0xf   :  { %800 = vmatprep.subr.mxu0 %v1023_v3  ;;  %827 = vmatprep.subr.mxu1 %v1023_v3  ;;  %v173_v1 = vsub.f32 %v1154_v43, %v172_v53  ;;  %v186_v2 = vand.u32 4294901760, %v1182_v55  ;;  %v1214_v8 = vsub.f32 %v17_v41, %v1165_v48  ;;  %v180_v9 = vsub.f32 %v1161_v47, %v179_v57  ;;  %p1008_p3 = por %p1007_p2, %p1006_p1 }
  0x10   :  { %801 = vmatpush3.msra.mxu0 %v1090_v17  ;;  %828 = vmatpush3.msra.mxu1 %v139_v44  ;;  %v1221_v13 = vand.u32 4294901760, %v14_v60  ;;  %v167_v14 = vand.u32 4294901760, %v166_v58  ;;  %v193_v19 = vand.u32 4294901760, %v1197_v61  ;;  %v1226_v26 = vsub.f32 %v12_v50, %v1199_v62 }
  0x11   :  { %802 = vmatprep.subr.mxu0 %v1023_v3  ;;  %829 = vmatprep.subr.mxu1 %v1023_v3  ;;  %v1229_v31 = vsub.f32 %v16_v49, %v1191_v59  ;;  %v1233_v32 = vand.u32 4294901760, %v13_v7  ;;  %v174_v33 = vand.u32 4294901760, %v173_v1  ;;  %v187_v36 = vsub.f32 %v1182_v55, %v186_v2  ;;  %p1009_p4 = pnand %p1008_p3, %p1002_p0 }
  0x12   :  { %803 = vmatpush3.msra.mxu0 %v1109_v25  ;;  %830 = vmatpush3.msra.mxu1 %v146_v51  ;;  %v200_v37 = vand.u32 4294901760, %v1214_v8  ;;  %v1241_v38 = vsub.f32 %v15_v54, %v1203_v63  ;;  %v181_v39 = vand.u32 4294901760, %v180_v9  ;;  %v194_v41 = vsub.f32 %v1197_v61, %v193_v19 }
  0x13   :  { %804 = vmatprep.subr.mxu0 %v1023_v3  ;;  %831 = vmatprep.subr.mxu1 %v1023_v3  ;;  %v112_v42 = vand.u32 4294901760, %v1226_v26  ;;  %v207_v44 = vand.u32 4294901760, %v1229_v31  ;;  %v1252_v49 = vsub.f32 %v14_v60, %v1221_v13  ;;  %v188_v50 = vand.u32 4294901760, %v187_v36 }
  0x14   :  { %805 = vmatpush3.msra.mxu0 %v1116_v28  ;;  %832 = vmatpush3.msra.mxu1 %v153_v56  ;;  %v201_v51 = vsub.f32 %v1214_v8, %v200_v37  ;;  %v214_v52 = vand.u32 4294901760, %v1241_v38  ;;  %v1262_v54 = vsub.f32 %v13_v7, %v1233_v32  ;;  %v195_v56 = vand.u32 4294901760, %v194_v41 }
  0x15   :  { %806 = vmatprep.subr.mxu0 %v1023_v3  ;;  %833 = vmatprep.subr.mxu1 %v1023_v3  ;;  %v113_v58 = vsub.f32 %v1226_v26, %v112_v42  ;;  %v208_v60 = vsub.f32 %v1229_v31, %v207_v44  ;;  %vm670_vm1 = vcmask 64512  }
  0x16   :  { %807 = vmatpush3.msra.mxu0 %v1136_v35  ;;  %834 = vmatpush3.msra.mxu1 %v160_v0  ;;  %v221_v0 = vand.u32 4294901760, %v1252_v49  ;;  %v202_v1 = vand.u32 4294901760, %v201_v51  ;;  %v215_v7 = vsub.f32 %v1241_v38, %v214_v52  ;;  %v228_v9 = vand.u32 4294901760, %v1262_v54 }
  0x17   :  { %808 = vmatprep.subr.mxu0 %v1023_v3  ;;  %835 = vmatprep.subr.mxu1 %v1023_v3 }
  0x18   :  { %809 = vmatpush3.msra.mxu0 %v1157_v45  ;;  %836 = vmatpush3.msra.mxu1 %v167_v14  ;;  %v114_v14 = vand.u32 4294901760, %v113_v58  ;;  %v222_v36 = vsub.f32 %v1252_v49, %v221_v0  ;;  %v229_v41 = vsub.f32 %v1262_v54, %v228_v9 }
  0x19   :  { %810 = vmatprep.subr.mxu0 %v1023_v3  ;;  %837 = vmatprep.subr.mxu1 %v1023_v3 }
  0x1a   :  { %811 = vmatpush3.msra.mxu0 %v1165_v48  ;;  %838 = vmatpush3.msra.mxu1 %v174_v33  ;;  %v209_v33 = vand.u32 4294901760, %v208_v60  ;;  %v230_v51 = vand.u32 4294901760, %v229_v41 }
  0x1b   :  { %812 = vmatprep.subr.mxu0 %v1023_v3  ;;  %839 = vmatprep.subr.mxu1 %v1023_v3 }
  0x1c   :  { %813 = vmatpush3.msra.mxu0 %v1191_v59  ;;  %840 = vmatpush3.msra.mxu1 %v181_v39  ;;  %v216_v39 = vand.u32 4294901760, %v215_v7 }
  0x1d   :  { %814 = vmatprep.subr.mxu0 %v1023_v3  ;;  %841 = vmatprep.subr.mxu1 %v1023_v3 }
  0x1e   :  { %815 = vmatpush3.msra.mxu0 %v1203_v63  ;;  %842 = vmatpush3.msra.mxu1 %v188_v50  ;;  %v223_v50 = vand.u32 4294901760, %v222_v36 }
  0x1f   :  { %816 = vmatprep.subr.mxu0 %v1023_v3  ;;  %843 = vmatprep.subr.mxu1 %v1023_v3 }
  0x20   :  { %817 = vmatpush3.msra.mxu0 %v1221_v13  ;;  %844 = vmatpush3.msra.mxu1 %v195_v56 }
  0x21   :  { %818 = vmatprep.subr.mxu0 %v1023_v3  ;;  %845 = vmatprep.subr.mxu1 %v1023_v3 }
  0x22   :  { %819 = vmatpush3.msra.mxu0 %v1233_v32  ;;  %846 = vmatpush3.msra.mxu1 %v202_v1 }
  0x23   :  { %847 = vmatprep.subr.mxu1 %v1023_v3  ;;  %858 = vmatprep.subr.mxu0 %v1023_v3 }
  0x24   :  { %821 = vmatmul.mubr.f32.vlgmr.msra.gmra.mxu0 %v114_v14  ;;  %848 = vmatpush3.msra.mxu1 %v209_v33 }
  0x25   :  { %859 = vmatpush3.msra.mxu0 %v1085_v15  ;;  %849 = vmatprep.subr.mxu1 %v1023_v3 }
  0x26   :  { %860 = vmatprep.subr.mxu0 %v1023_v3  ;;  %850 = vmatpush3.msra.mxu1 %v216_v39 }
  0x27   :  { %861 = vmatpush3.msra.mxu0 %v1088_v16  ;;  %851 = vmatprep.subr.mxu1 %v1023_v3 }
  0x28   :  { %862 = vmatprep.subr.mxu0 %v1023_v3  ;;  %852 = vmatpush3.msra.mxu1 %v223_v50 }
  0x29   :  { %863 = vmatpush3.msra.mxu0 %v1093_v18  ;;  %853 = vmatprep.subr.mxu1 %v1023_v3 }
  0x2a   :  { %864 = vmatprep.subr.mxu0 %v1023_v3  ;;  %854 = vmatpush3.msra.mxu1 %v230_v51 }
  0x2b   :  { %865 = vmatpush3.msra.mxu0 %v1100_v20  ;;  %856 = vmatmul.mubr.f32.vlgmr.msra.gmra.mxu1 %v1199_v62 }
  0x2c   :  { %866 = vmatprep.subr.mxu0 %v1023_v3  ;;  %893 = vmatprep.subr.mxu1 %v1023_v3 }
  0x2d   :  { %867 = vmatpush3.msra.mxu0 %v1103_v21  ;;  %894 = vmatpush3.msra.mxu1 %v1051_v4 }
  0x2e   :  { %868 = vmatprep.subr.mxu0 %v1023_v3  ;;  %895 = vmatprep.subr.mxu1 %v1023_v3 }
  0x2f   :  { %869 = vmatpush3.msra.mxu0 %v1120_v30  ;;  %896 = vmatpush3.msra.mxu1 %v1053_v5 }
  0x30   :  { %870 = vmatprep.subr.mxu0 %v1023_v3  ;;  %897 = vmatprep.subr.mxu1 %v1023_v3 }
  0x31   :  { %871 = vmatpush3.msra.mxu0 %v1133_v34  ;;  %898 = vmatpush3.msra.mxu1 %v1055_v6 }
  0x32   :  { %872 = vmatprep.subr.mxu0 %v1023_v3  ;;  %899 = vmatprep.subr.mxu1 %v1023_v3 }
  0x33   :  { %873 = vmatpush3.msra.mxu0 %v1154_v43  ;;  %900 = vmatpush3.msra.mxu1 %v1067_v10 }
  0x34   :  { %874 = vmatprep.subr.mxu0 %v1023_v3  ;;  %901 = vmatprep.subr.mxu1 %v1023_v3 }
  0x35   :  { %875 = vmatpush3.msra.mxu0 %v1161_v47  ;;  %902 = vmatpush3.msra.mxu1 %v1069_v11 }
  0x36   :  { %876 = vmatprep.subr.mxu0 %v1023_v3  ;;  %903 = vmatprep.subr.mxu1 %v1023_v3 }
  0x37   :  { %877 = vmatpush3.msra.mxu0 %v1182_v55  ;;  %904 = vmatpush3.msra.mxu1 %v1071_v12 }
  0x38   :  { %878 = vmatprep.subr.mxu0 %v1023_v3  ;;  %905 = vmatprep.subr.mxu1 %v1023_v3 }
  0x39   :  { %879 = vmatpush3.msra.mxu0 %v1197_v61  ;;  %906 = vmatpush3.msra.mxu1 %v1090_v17 }
  0x3a   :  { %880 = vmatprep.subr.mxu0 %v1023_v3  ;;  %907 = vmatprep.subr.mxu1 %v1023_v3 }
  0x3b   :  { %881 = vmatpush3.msra.mxu0 %v1214_v8  ;;  %908 = vmatpush3.msra.mxu1 %v1109_v25 }
  0x3c   :  { %882 = vmatprep.subr.mxu0 %v1023_v3  ;;  %909 = vmatprep.subr.mxu1 %v1023_v3 }
  0x3d   :  { %883 = vmatpush3.msra.mxu0 %v1229_v31  ;;  %910 = vmatpush3.msra.mxu1 %v1116_v28 }
  0x3e   :  { %884 = vmatprep.subr.mxu0 %v1023_v3  ;;  %911 = vmatprep.subr.mxu1 %v1023_v3 }
  0x3f   :  { %885 = vmatpush3.msra.mxu0 %v1241_v38  ;;  %912 = vmatpush3.msra.mxu1 %v1136_v35 }
  0x40   :  { %886 = vmatprep.subr.mxu0 %v1023_v3  ;;  %913 = vmatprep.subr.mxu1 %v1023_v3 }
  0x41   :  { %887 = vmatpush3.msra.mxu0 %v1252_v49  ;;  %914 = vmatpush3.msra.mxu1 %v1157_v45 }
  0x42   :  { %888 = vmatprep.subr.mxu0 %v1023_v3  ;;  %915 = vmatprep.subr.mxu1 %v1023_v3 }
  0x43   :  { %889 = vmatpush3.msra.mxu0 %v1262_v54  ;;  %890 = vmatprep.mubr.msk.f32.mxu0 %vm1024_vm0, %v1023_v3 }
  0x44   :  { %916 = vmatpush3.msra.mxu1 %v1165_v48  ;;  %891 = vmatmul.mubr.f32.vlgmr.msra.gmra.mxu0 %v1226_v26 }
  0x45   :  { %917 = vmatprep.subr.mxu1 %v1023_v3  ;;  %928 = vmatprep.subr.mxu0 %v1023_v3 }
  0x46   :  { %918 = vmatpush3.msra.mxu1 %v1191_v59  ;;  %929 = vmatpush3.msra.mxu0 %v123_v22 }
  0x47   :  { %919 = vmatprep.subr.mxu1 %v1023_v3  ;;  %930 = vmatprep.subr.mxu0 %v1023_v3 }
  0x48   :  { %920 = vmatpush3.msra.mxu1 %v1203_v63  ;;  %931 = vmatpush3.msra.mxu0 %v130_v23 }
  0x49   :  { %921 = vmatprep.subr.mxu1 %v1023_v3  ;;  %932 = vmatprep.subr.mxu0 %v1023_v3 }
  0x4a   :  { %922 = vmatpush3.msra.mxu1 %v1221_v13  ;;  %933 = vmatpush3.msra.mxu0 %v137_v24 }
  0x4b   :  { %923 = vmatprep.subr.mxu1 %v1023_v3  ;;  %934 = vmatprep.subr.mxu0 %v1023_v3 }
  0x4c   :  { %924 = vmatpush3.msra.mxu1 %v1233_v32  ;;  %925 = vmatprep.mubr.msk.f32.mxu1 %vm1024_vm0, %v1023_v3 }
  0x4d   :  { %935 = vmatpush3.msra.mxu0 %v144_v27  ;;  %926 = vmatmul.mubr.f32.vlgmr.msra.gmra.mxu1 %v112_v42 }
  0x4e   :  { %936 = vmatprep.subr.mxu0 %v1023_v3  ;;  %963 = vmatprep.subr.mxu1 %v1023_v3 }
  0x4f   :  { %937 = vmatpush3.msra.mxu0 %v151_v29  ;;  %964 = vmatpush3.msra.mxu1 %v1051_v4 }
  0x50   :  { %938 = vmatprep.subr.mxu0 %v1023_v3  ;;  %965 = vmatprep.subr.mxu1 %v1023_v3 }
  0x51   :  { %939 = vmatpush3.msra.mxu0 %v158_v40  ;;  %966 = vmatpush3.msra.mxu1 %v1053_v5 }
  0x52   :  { %940 = vmatprep.subr.mxu0 %v1023_v3  ;;  %967 = vmatprep.subr.mxu1 %v1023_v3 }
  0x53   :  { %941 = vmatpush3.msra.mxu0 %v165_v46  ;;  %968 = vmatpush3.msra.mxu1 %v1055_v6 }
  0x54   :  { %942 = vmatprep.subr.mxu0 %v1023_v3  ;;  %969 = vmatprep.subr.mxu1 %v1023_v3 }
  0x55   :  { %943 = vmatpush3.msra.mxu0 %v172_v53  ;;  %970 = vmatpush3.msra.mxu1 %v1067_v10 }
  0x56   :  { %944 = vmatprep.subr.mxu0 %v1023_v3  ;;  %971 = vmatprep.subr.mxu1 %v1023_v3 }
  0x57   :  { %945 = vmatpush3.msra.mxu0 %v179_v57  ;;  %972 = vmatpush3.msra.mxu1 %v1069_v11 }
  0x58   :  { %946 = vmatprep.subr.mxu0 %v1023_v3  ;;  %973 = vmatprep.subr.mxu1 %v1023_v3 }
  0x59   :  { %947 = vmatpush3.msra.mxu0 %v186_v2  ;;  %974 = vmatpush3.msra.mxu1 %v1071_v12 }
  0x5a   :  { %948 = vmatprep.subr.mxu0 %v1023_v3  ;;  %975 = vmatprep.subr.mxu1 %v1023_v3 }
  0x5b   :  { %949 = vmatpush3.msra.mxu0 %v193_v19  ;;  %976 = vmatpush3.msra.mxu1 %v1090_v17 }
  0x5c   :  { %950 = vmatprep.subr.mxu0 %v1023_v3  ;;  %977 = vmatprep.subr.mxu1 %v1023_v3 }
  0x5d   :  { %951 = vmatpush3.msra.mxu0 %v200_v37  ;;  %978 = vmatpush3.msra.mxu1 %v1109_v25 }
  0x5e   :  { %952 = vmatprep.subr.mxu0 %v1023_v3  ;;  %979 = vmatprep.subr.mxu1 %v1023_v3 }
  0x5f   :  { %953 = vmatpush3.msra.mxu0 %v207_v44  ;;  %980 = vmatpush3.msra.mxu1 %v1116_v28 }
  0x60   :  { %954 = vmatprep.subr.mxu0 %v1023_v3  ;;  %981 = vmatprep.subr.mxu1 %v1023_v3 }
  0x61   :  { %955 = vmatpush3.msra.mxu0 %v214_v52  ;;  %982 = vmatpush3.msra.mxu1 %v1136_v35 }
  0x62   :  { %956 = vmatprep.subr.mxu0 %v1023_v3  ;;  %983 = vmatprep.subr.mxu1 %v1023_v3 }
  0x63   :  { %957 = vmatpush3.msra.mxu0 %v221_v0  ;;  %984 = vmatpush3.msra.mxu1 %v1157_v45 }
  0x64   :  { %958 = vmatprep.subr.mxu0 %v1023_v3  ;;  %985 = vmatprep.subr.mxu1 %v1023_v3 }
  0x65   :  { %959 = vmatpush3.msra.mxu0 %v228_v9  ;;  %960 = vmatprep.mubr.msk.f32.mxu0 %vm1024_vm0, %v1023_v3 }
  0x66   :  { %986 = vmatpush3.msra.mxu1 %v1165_v48  ;;  %961 = vmatmul.mubr.f32.vlgmr.msra.gmra.mxu0 %v1199_v62 }
  0x67   :  { %987 = vmatprep.subr.mxu1 %v1023_v3  ;;  %995 = vmatprep.mubr.msk.f32.mxu1 %vm1024_vm0, %v1023_v3 }
  0x68   :  { %988 = vmatpush3.msra.mxu1 %v1191_v59 }
  0x69   :  { %989 = vmatprep.subr.mxu1 %v1023_v3 }
  0x6a   :  { %990 = vmatpush3.msra.mxu1 %v1203_v63 }
  0x6b   :  { %991 = vmatprep.subr.mxu1 %v1023_v3 }
  0x6c   :  { %992 = vmatpush3.msra.mxu1 %v1221_v13 }
  0x6d   :  { %993 = vmatprep.subr.mxu1 %v1023_v3 }
  0x6e   :  { %994 = vmatpush3.msra.mxu1 %v1233_v32 }
  0x6f   :  { %996 = vmatmul.mubr.f32.vlgmr.msra.gmra.mxu1 %v1199_v62 }
  0xe4   :  { %v116_v4 = vpop.f32.mrf.mxu0 }
  0xe6   :  { %v822_v5 = vpop.f32.mrf.mxu0 }
  0xeb   :  { %v267_v6 = vpop.f32.mrf.mxu1 }
  0xec   :  { %v268_v18 = vadd.f32 %v267_v6, %v116_v4 }
  0xed   :  { %v857_v10 = vpop.f32.mrf.mxu1 }
 0x104   :  { %v371_v11 = vpop.f32.mrf.mxu0 }
 0x105   :  { %v372_v21 = vadd.f32 %v371_v11, %v268_v18 }
 0x106   :  { %v892_v12 = vpop.f32.mrf.mxu0 }
 0x10d   :  { %v460_v15 = vpop.f32.mrf.mxu1 }
 0x10e   :  { %v461_v22 = vadd.f32 %v460_v15, %v372_v21 }
 0x10f   :  { %v927_v16 = vpop.f32.mrf.mxu1 }
 0x126   :  { %v579_v17 = vpop.f32.mrf.mxu0 }
 0x127   :  { %v580_v3 = vadd.f32 %v579_v17, %v461_v22 }
 0x128   :  { %v962_v20 = vpop.f32.mrf.mxu0 }
 0x12f   :  { %v666_v23 = vpop.f32.mrf.mxu1 }
 0x130   :  { %v667_v24 = vadd.f32 %v666_v23, %v580_v3 }
 0x131   :  { %v997_v25 = vpop.f32.mrf.mxu1 }
 0x132   :  { %671 = vst.msk [vmem:[#allocation2] sm:$0xff] %vm670_vm1, %v667_v24 }
 0x133   :  { %1012 = shalt.err (!%p1009_p4)
}
 0x134   :  { %681 = dma.vmem_to_hbm [thread:$0]  %s679_s14, 128, %s1460_s2, [#allocation3]  }
 0x135   :  { %1021 = dma.done.wait [#allocation3], 128  }
 0x136   :  { %1022 = vsyncadd [#allocation3], 4294967168 }
 0x137   :  { %685 = vsyncpa [#allocation3], 1 }

</bundles_post_ra>
